<compile_context>
chip_gen: v5e
topology: v5e:2x2
jax: 0.10.0
libtpu: 0.0.40
codegen_flags: <defaults>
</compile_context>

<pallas_src>
import functools

import numpy as np
import jax
import jax.numpy as jnp
from jax.experimental import pallas as pl
from jax.experimental.pallas import tpu as pltpu


def _round_up(x, m):
    return (x + m - 1) // m * m


# ----------------------------- tiling helpers -----------------------------

def _pick_m(M, cap=512):
    """Pad M to sublane granularity and pick a row tile (mult of 16 when split)."""
    p = _round_up(M, 8)
    if p > cap:
        return _round_up(M, cap), cap
    if p >= 256 and p % 32 == 0:
        return p, p // 2          # >=2 parallel M blocks (helps v7x) when cheap
    return p, p


def _pick_k(K, cap=1024):
    p = _round_up(K, 128)
    if p <= cap:
        return p, p
    for t in range(cap, 0, -128):
        if p % t == 0:
            return p, t
    return _round_up(K, 512), 512


def _pick_n(N, cap=512):
    p = _round_up(N, 128)
    divs = [d for d in range(128, min(cap, p) + 1, 128) if p % d == 0]
    if p >= 256:
        split = [d for d in divs if p // d >= 2]
        if split:
            return p, max(split)  # >=2 parallel N blocks for the deep layers
    return p, max(divs)


# ----------------------------- Pallas kernels -----------------------------

def _matmul_bn_kernel(*refs, relu, has_res):
    """acc += A@W ; on last K step: out = act(acc*scale + bias (+ residual))."""
    if has_res:
        a_ref, w_ref, s_ref, b_ref, r_ref, o_ref, acc_ref = refs
    else:
        a_ref, w_ref, s_ref, b_ref, o_ref, acc_ref = refs
        r_ref = None
    k = pl.program_id(2)

    @pl.when(k == 0)
    def _():
        acc_ref[...] = jnp.zeros_like(acc_ref)

    acc_ref[...] += jnp.dot(a_ref[...], w_ref[...],
                            preferred_element_type=jnp.float32)

    @pl.when(k == pl.num_programs(2) - 1)
    def _():
        y = acc_ref[...] * s_ref[...] + b_ref[...]
        if has_res:
            y = y + r_ref[...]
        if relu:
            y = jnp.maximum(y, 0.0)
        o_ref[...] = y.astype(o_ref.dtype)


@functools.partial(jax.jit, static_argnames=("relu",))
def fused_matmul_bn(a, w, scale, bias, residual=None, *, relu=True):
    """out[:M,:N] = act((a @ w) * scale + bias (+ residual)); bf16 in, f32 acc."""
    M, K = a.shape
    N = w.shape[1]
    Mp, tm = _pick_m(M)
    Kp, tk = _pick_k(K)
    Np, tn = _pick_n(N)

    a_p = jnp.pad(a, ((0, Mp - M), (0, Kp - K))).astype(jnp.bfloat16)
    w_p = jnp.pad(w, ((0, Kp - K), (0, Np - N))).astype(jnp.bfloat16)
    s_p = jnp.pad(scale.reshape(1, N), ((0, 0), (0, Np - N)))
    b_p = jnp.pad(bias.reshape(1, N), ((0, 0), (0, Np - N)))

    has_res = residual is not None
    in_specs = [
        pl.BlockSpec((tm, tk), lambda i, j, k: (i, k)),   # A  (bf16)
        pl.BlockSpec((tk, tn), lambda i, j, k: (k, j)),   # W  (bf16)
        pl.BlockSpec((1, tn), lambda i, j, k: (0, j)),    # folded-BN scale (f32)
        pl.BlockSpec((1, tn), lambda i, j, k: (0, j)),    # folded-BN bias  (f32)
    ]
    args = [a_p, w_p, s_p, b_p]
    if has_res:
        r_p = jnp.pad(residual, ((0, Mp - M), (0, Np - N))).astype(jnp.float32)
        in_specs.append(pl.BlockSpec((tm, tn), lambda i, j, k: (i, j)))
        args.append(r_p)

    out = pl.pallas_call(
        functools.partial(_matmul_bn_kernel, relu=relu, has_res=has_res),
        out_shape=jax.ShapeDtypeStruct((Mp, Np), jnp.float32),
        grid_spec=pltpu.PrefetchScalarGridSpec(
            num_scalar_prefetch=0,
            grid=(Mp // tm, Np // tn, Kp // tk),
            in_specs=in_specs,
            out_specs=pl.BlockSpec((tm, tn), lambda i, j, k: (i, j)),
            scratch_shapes=[pltpu.VMEM((tm, tn), jnp.float32)],
        ),
        compiler_params=pltpu.CompilerParams(
            dimension_semantics=("parallel", "parallel", "arbitrary")),
    )(*args)
    return out[:M, :N]


@functools.partial(jax.jit, static_argnames=("relu",))
def fused_grouped_matmul_bn(a, wband, scale, bias, *, relu=True):
    """Grouped conv matmul: A is group-major im2col (M, G*9*cin_g); wband holds,
    per 128-wide output tile, only the 1152 K rows that can be non-zero."""
    M, K = a.shape
    N = scale.shape[0]
    ntiles = N // 128
    kt = K // ntiles                       # = 9 * 128 rows per output tile
    Mp, tm = _pick_m(M)

    a_p = jnp.pad(a, ((0, Mp - M), (0, 0))).astype(jnp.bfloat16)
    w_p = wband.astype(jnp.bfloat16)       # (ntiles*kt, 128)
    s_p = scale.reshape(1, N)
    b_p = bias.reshape(1, N)

    out = pl.pallas_call(
        functools.partial(_matmul_bn_kernel, relu=relu, has_res=False),
        out_shape=jax.ShapeDtypeStruct((Mp, N), jnp.float32),
        grid_spec=pltpu.PrefetchScalarGridSpec(
            num_scalar_prefetch=0,
            grid=(Mp // tm, ntiles, 1),
            in_specs=[
                pl.BlockSpec((tm, kt), lambda i, j, k: (i, j)),    # A tile
                pl.BlockSpec((kt, 128), lambda i, j, k: (j, 0)),   # non-zero W band
                pl.BlockSpec((1, 128), lambda i, j, k: (0, j)),
                pl.BlockSpec((1, 128), lambda i, j, k: (0, j)),
            ],
            out_specs=pl.BlockSpec((tm, 128), lambda i, j, k: (i, j)),
            scratch_shapes=[pltpu.VMEM((tm, 128), jnp.float32)],
        ),
        compiler_params=pltpu.CompilerParams(
            dimension_semantics=("parallel", "parallel", "arbitrary")),
    )(a_p, w_p, s_p, b_p)
    return out[:M]


def _axis0_max_kernel(x_ref, o_ref):
    o_ref[...] = jnp.max(x_ref[...], axis=0)


def _axis0_mean_kernel(x_ref, o_ref):
    o_ref[...] = jnp.mean(x_ref[...], axis=0)


# ----------------------------- glue (plain JAX) -----------------------------

def _im2col(x, kh, kw, stride, pad):
    """x: (B,H,W,C) NHWC -> patches (B*Ho*Wo, kh*kw*C), tap-major / channel-minor."""
    B, H, W, C = x.shape
    Ho = (H + 2 * pad - kh) // stride + 1
    Wo = (W + 2 * pad - kw) // stride + 1
    xp = jnp.pad(x, ((0, 0), (pad, pad), (pad, pad), (0, 0)))
    taps = [xp[:, i:i + stride * Ho:stride, j:j + stride * Wo:stride, :]
            for i in range(kh) for j in range(kw)]
    pat = jnp.stack(taps, axis=3)                      # (B, Ho, Wo, kh*kw, C)
    return pat.reshape(B * Ho * Wo, kh * kw * C), Ho, Wo


def _im2col_grouped(x, stride, pad, groups):
    """Group-major im2col for 3x3 grouped conv: (M, groups * 9 * cin_g)."""
    B, H, W, C = x.shape
    Ho = (H + 2 * pad - 3) // stride + 1
    Wo = (W + 2 * pad - 3) // stride + 1
    xp = jnp.pad(x, ((0, 0), (pad, pad), (pad, pad), (0, 0)))
    taps = [xp[:, i:i + stride * Ho:stride, j:j + stride * Wo:stride, :]
            for i in range(3) for j in range(3)]
    pat = jnp.stack(taps, axis=3)                      # (B, Ho, Wo, 9, C)
    cg = C // groups
    pat = pat.reshape(B, Ho, Wo, 9, groups, cg)
    pat = jnp.transpose(pat, (0, 1, 2, 4, 3, 5))       # (B, Ho, Wo, G, 9, cg)
    return pat.reshape(B * Ho * Wo, groups * 9 * cg), Ho, Wo


def conv_bn(x, p, *, stride, pad, relu=True, residual=None):
    B = x.shape[0]
    xb = x.astype(jnp.bfloat16)
    if p["kh"] == 1 and p["kw"] == 1:
        if stride > 1:
            xb = xb[:, ::stride, ::stride, :]          # 1x1: no im2col needed
        _, Ho, Wo, C = xb.shape
        a = xb.reshape(B * Ho * Wo, C)
    else:
        a, Ho, Wo = _im2col(xb, p["kh"], p["kw"], stride, pad)
    res = None
    if residual is not None:
        res = residual.reshape(B * Ho * Wo, residual.shape[-1]).astype(jnp.float32)
    y = fused_matmul_bn(a, p["w"], p["scale"], p["bias"], res, relu=relu)
    return y.reshape(B, Ho, Wo, -1)


def grouped_conv_bn(x, p, *, stride, relu=True):
    B = x.shape[0]
    a, Ho, Wo = _im2col_grouped(x.astype(jnp.bfloat16), stride, 1, p["groups"])
    y = fused_grouped_matmul_bn(a, p["wband"], p["scale"], p["bias"], relu=relu)
    return y.reshape(B, Ho, Wo, -1)


def max_pool_3x3_s2_p1(x):
    B, H, W, C = x.shape
    Ho = (H + 2 - 3) // 2 + 1
    Wo = (W + 2 - 3) // 2 + 1
    neg = jnp.finfo(x.dtype).min
    xp = jnp.pad(x, ((0, 0), (1, 1), (1, 1), (0, 0)), constant_values=neg)
    taps = [xp[:, i:i + 2 * Ho:2, j:j + 2 * Wo:2, :]
            for i in range(3) for j in range(3)]
    M = B * Ho * Wo
    pat = jnp.stack(taps, axis=0).reshape(9, M, C)
    # fold spatial rows into lanes so stores are 128-lane dense when C < 128
    f = 1
    if C < 128 and 128 % C == 0 and M % (128 // C) == 0:
        f = 128 // C
    Mf, Cf = M // f, C * f
    pat = pat.reshape(9, Mf, Cf)
    Mp, tmr = _pick_m(Mf)
    pat = jnp.pad(pat, ((0, 0), (0, Mp - Mf), (0, 0)))
    out = pl.pallas_call(
        _axis0_max_kernel,
        out_shape=jax.ShapeDtypeStruct((Mp, Cf), x.dtype),
        grid_spec=pltpu.PrefetchScalarGridSpec(
            num_scalar_prefetch=0,
            grid=(Mp // tmr,),
            in_specs=[pl.BlockSpec((9, tmr, Cf), lambda i: (0, i, 0))],
            out_specs=pl.BlockSpec((tmr, Cf), lambda i: (i, 0)),
        ),
        compiler_params=pltpu.CompilerParams(dimension_semantics=("parallel",)),
    )(pat)
    return out[:Mf].reshape(B, Ho, Wo, C)


def global_avg_pool(x):
    """AdaptiveAvgPool2d(1) + Flatten -> (B, C), tiled over channels."""
    B, H, W, C = x.shape
    xr = jnp.transpose(x.reshape(B, H * W, C), (1, 0, 2))   # (H*W, B, C)
    tc = 512 if C % 512 == 0 else (128 if C % 128 == 0 else C)
    return pl.pallas_call(
        _axis0_mean_kernel,
        out_shape=jax.ShapeDtypeStruct((B, C), x.dtype),
        grid_spec=pltpu.PrefetchScalarGridSpec(
            num_scalar_prefetch=0,
            grid=(C // tc,),
            in_specs=[pl.BlockSpec((H * W, B, tc), lambda j: (0, 0, j))],
            out_specs=pl.BlockSpec((B, tc), lambda j: (0, j)),
        ),
        compiler_params=pltpu.CompilerParams(dimension_semantics=("parallel",)),
    )(xr)


# ----------------------------- parameters -----------------------------

def _fold_bn(rng, cout):
    # eval-mode BatchNorm is exactly a per-channel affine -> fold as scale/bias
    scale = rng.normal(1.0, 0.05, size=(cout,))
    bias = rng.normal(0.0, 0.05, size=(cout,))
    return jnp.asarray(scale, jnp.float32), jnp.asarray(bias, jnp.float32)


def _make_conv(rng, kh, kw, cin, cout):
    std = (2.0 / (kh * kw * cin)) ** 0.5
    w = rng.normal(0.0, std, size=(kh * kw * cin, cout))
    s, b = _fold_bn(rng, cout)
    return {"w": jnp.asarray(w, jnp.bfloat16), "scale": s, "bias": b,
            "kh": kh, "kw": kw}


def _make_grouped_conv(rng, cin, cout, groups=32):
    """3x3 grouped conv stored as a compact band: for each 128-wide output tile
    only the (9*128, 128) block of rows that can be non-zero is kept."""
    assert cin == cout and cout % 128 == 0
    cin_g, cout_g = cin // groups, cout // groups
    std = (2.0 / (9 * cin_g)) ** 0.5
    wg = rng.normal(0.0, std, size=(groups, 9 * cin_g, cout_g))
    gpt = 128 // cout_g                    # groups per 128-column output tile
    ntiles = cout // 128
    kt = 9 * 128                           # band rows per output tile
    band = np.zeros((ntiles * kt, 128), dtype=np.float32)
    for g in range(groups):
        jt, gl = g // gpt, g % gpt
        r0 = jt * kt + gl * 9 * cin_g
        c0 = gl * cout_g
        band[r0:r0 + 9 * cin_g, c0:c0 + cout_g] = wg[g]
    s, b = _fold_bn(rng, cout)
    return {"wband": jnp.asarray(band, jnp.bfloat16), "scale": s, "bias": b,
            "groups": groups}


def make_resnext50_params(seed=0):
    """ResNeXt50_32x4d (torchvision) minus the final fc, synthetic deterministic init."""
    rng = np.random.default_rng(seed)
    params = {"stem": _make_conv(rng, 7, 7, 3, 64)}
    stage_defs = [  # (num_blocks, bottleneck_width, out_channels, first_stride)
        (3, 128, 256, 1),
        (4, 256, 512, 2),
        (6, 512, 1024, 2),
        (3, 1024, 2048, 2),
    ]
    in_ch = 64
    layers = []
    for (nblocks, width, out_ch, stride) in stage_defs:
        blocks = []
        for b in range(nblocks):
            blk = {
                "c1": _make_conv(rng, 1, 1, in_ch, width),
                "c2": _make_grouped_conv(rng, width, width, groups=32),
                "c3": _make_conv(rng, 1, 1, width, out_ch),
                "stride": stride if b == 0 else 1,
            }
            if b == 0:  # stride != 1 or in_ch != out_ch -> downsample branch
                blk["down"] = _make_conv(rng, 1, 1, in_ch, out_ch)
            blocks.append(blk)
            in_ch = out_ch
        layers.append(blocks)
    params["layers"] = layers
    return params


# ----------------------------- forward -----------------------------

def bottleneck(x, blk):
    s = blk["stride"]
    identity = x
    out = conv_bn(x, blk["c1"], stride=1, pad=0, relu=True)
    out = grouped_conv_bn(out, blk["c2"], stride=s, relu=True)
    if "down" in blk:
        identity = conv_bn(x, blk["down"], stride=s, pad=0, relu=False)
    # conv3 + bn3 + residual add + relu, all fused in the Pallas epilogue
    out = conv_bn(out, blk["c3"], stride=1, pad=0, relu=True, residual=identity)
    return out


def image_feature_extractor_forward(params, x_nchw):
    # NCHW (PyTorch) -> NHWC (TPU friendly)
    x = jnp.transpose(x_nchw, (0, 2, 3, 1)).astype(jnp.float32)
    x = conv_bn(x, params["stem"], stride=2, pad=3, relu=True)  # conv1+bn1+relu
    x = max_pool_3x3_s2_p1(x)                                   # maxpool
    for blocks in params["layers"]:                             # layer1..layer4
        for blk in blocks:
            x = bottleneck(x, blk)
    return global_avg_pool(x)                                   # (B, 2048)


if __name__ == "__main__":
    params = make_resnext50_params(seed=0)
    key = jax.random.PRNGKey(0)
    # small-but-consistent input: RGB images, NCHW like the PyTorch module
    x = jax.random.normal(key, (2, 3, 64, 64), dtype=jnp.float32)
    feats = image_feature_extractor_forward(params, x)
    feats = jax.block_until_ready(feats)
    assert feats.shape == (2, 2048) and feats.dtype == jnp.float32
    assert bool(jnp.all(jnp.isfinite(feats)))
    print("KERNEL_OK")
</pallas_src>

<mosaic_0001>
module attributes {stable_mosaic.version = 11 : i64} {
  func.func @_matmul_bn_kernel(%arg0: i32, %arg1: i32, %arg2: i32, %arg3: memref<512x256xbf16, #tpu.memory_space<vmem>>, %arg4: memref<256x128xbf16, #tpu.memory_space<vmem>>, %arg5: memref<1x128xf32, #tpu.memory_space<vmem>>, %arg6: memref<1x128xf32, #tpu.memory_space<vmem>>, %arg7: memref<512x128xf32, #tpu.memory_space<vmem>>, %arg8: memref<512x128xf32, #tpu.memory_space<vmem>>) attributes {dimension_semantics = [#tpu.dimension_semantics<parallel>, #tpu.dimension_semantics<parallel>, #tpu.dimension_semantics<arbitrary>], iteration_bounds = array<i64: 4, 1, 1>, scalar_prefetch = 0 : i64, scratch_operands = 1 : i64, tpu.core_type = #tpu.core_type<tc>, window_params = [{transform_indices = @transform_0, window_bounds = array<i64: 512, 256>}, {transform_indices = @transform_1, window_bounds = array<i64: 256, 128>}, {transform_indices = @transform_2, window_bounds = array<i64: 1, 128>}, {transform_indices = @transform_3, window_bounds = array<i64: 1, 128>}, {transform_indices = @transform_4, window_bounds = array<i64: 512, 128>}]} {
    %c0_i32 = arith.constant 0 : i32
    %0 = arith.cmpi eq, %arg2, %c0_i32 : i32
    %1 = arith.extui %0 : i1 to i32
    %c0_i32_0 = arith.constant 0 : i32
    %2 = arith.cmpi ne, %1, %c0_i32_0 : i32
    scf.if %2 {
      %cst_10 = arith.constant 0.000000e+00 : f32
      %12 = vector.broadcast %cst_10 : f32 to vector<512x128xf32>
      %c0_11 = arith.constant 0 : index
      %c0_12 = arith.constant 0 : index
      %13 = vector.load %arg8[%c0_11, %c0_12] : memref<512x128xf32, #tpu.memory_space<vmem>>, vector<512x128xf32>
      tpu.vector_store %arg8[%c0_11, %c0_12], %12 {strides = array<i32>} : memref<512x128xf32, #tpu.memory_space<vmem>>, vector<512x128xf32>,
    } else {
    }
    %c0 = arith.constant 0 : index
    %c0_1 = arith.constant 0 : index
    %3 = vector.load %arg8[%c0, %c0_1] : memref<512x128xf32, #tpu.memory_space<vmem>>, vector<512x128xf32>
    %c0_2 = arith.constant 0 : index
    %c0_3 = arith.constant 0 : index
    %4 = vector.load %arg3[%c0_2, %c0_3] : memref<512x256xbf16, #tpu.memory_space<vmem>>, vector<512x256xbf16>
    %c0_4 = arith.constant 0 : index
    %c0_5 = arith.constant 0 : index
    %5 = vector.load %arg4[%c0_4, %c0_5] : memref<256x128xbf16, #tpu.memory_space<vmem>>, vector<256x128xbf16>
    %cst = arith.constant dense<0.000000e+00> : vector<512x128xf32>
    %6 = tpu.matmul %4, %5, %cst {dimension_numbers = #tpu.dot_dimension_numbers<[1], [0], [0], [1], [0, 0, 1, 1], [], []>} : vector<512x256xbf16>, vector<256x128xbf16>, vector<512x128xf32> -> vector<512x128xf32>
    %7 = arith.addf %3, %6 : vector<512x128xf32>
    %c0_6 = arith.constant 0 : index
    %c0_7 = arith.constant 0 : index
    %8 = vector.load %arg8[%c0_6, %c0_7] : memref<512x128xf32, #tpu.memory_space<vmem>>, vector<512x128xf32>
    tpu.vector_store %arg8[%c0_6, %c0_7], %7 {strides = array<i32>} : memref<512x128xf32, #tpu.memory_space<vmem>>, vector<512x128xf32>,
    %c0_i32_8 = arith.constant 0 : i32
    %9 = arith.cmpi eq, %arg2, %c0_i32_8 : i32
    %10 = arith.extui %9 : i1 to i32
    %c0_i32_9 = arith.constant 0 : i32
    %11 = arith.cmpi ne, %10, %c0_i32_9 : i32
    scf.if %11 {
      %c0_10 = arith.constant 0 : index
      %c0_11 = arith.constant 0 : index
      %12 = vector.load %arg8[%c0_10, %c0_11] : memref<512x128xf32, #tpu.memory_space<vmem>>, vector<512x128xf32>
      %c0_12 = arith.constant 0 : index
      %c0_13 = arith.constant 0 : index
      %13 = vector.load %arg5[%c0_12, %c0_13] : memref<1x128xf32, #tpu.memory_space<vmem>>, vector<1x128xf32>
      %14 = vector.broadcast %13 : vector<1x128xf32> to vector<512x128xf32>
      %15 = arith.mulf %12, %14 : vector<512x128xf32>
      %c0_14 = arith.constant 0 : index
      %c0_15 = arith.constant 0 : index
      %16 = vector.load %arg6[%c0_14, %c0_15] : memref<1x128xf32, #tpu.memory_space<vmem>>, vector<1x128xf32>
      %17 = vector.broadcast %16 : vector<1x128xf32> to vector<512x128xf32>
      %18 = arith.addf %15, %17 : vector<512x128xf32>
      %cst_16 = arith.constant 0.000000e+00 : f32
      %19 = vector.broadcast %cst_16 : f32 to vector<512x128xf32>
      %20 = arith.maximumf %18, %19 : vector<512x128xf32>
      %c0_17 = arith.constant 0 : index
      %c0_18 = arith.constant 0 : index
      %21 = vector.load %arg7[%c0_17, %c0_18] : memref<512x128xf32, #tpu.memory_space<vmem>>, vector<512x128xf32>
      tpu.vector_store %arg7[%c0_17, %c0_18], %20 {strides = array<i32>} : memref<512x128xf32, #tpu.memory_space<vmem>>, vector<512x128xf32>,
    } else {
    }
    return
  }
  func.func @transform_0(%arg0: i32, %arg1: i32, %arg2: i32) -> (i32, i32) {
    %c0_i32 = arith.constant 0 : i32
    return %arg0, %arg2 : i32, i32
  }
  func.func @transform_1(%arg0: i32, %arg1: i32, %arg2: i32) -> (i32, i32) {
    %c0_i32 = arith.constant 0 : i32
    return %arg2, %arg1 : i32, i32
  }
  func.func @transform_2(%arg0: i32, %arg1: i32, %arg2: i32) -> (i32, i32) {
    %c0_i32 = arith.constant 0 : i32
    %c0_i32_0 = arith.constant 0 : i32
    return %c0_i32, %arg1 : i32, i32
  }
  func.func @transform_3(%arg0: i32, %arg1: i32, %arg2: i32) -> (i32, i32) {
    %c0_i32 = arith.constant 0 : i32
    %c0_i32_0 = arith.constant 0 : i32
    return %c0_i32, %arg1 : i32, i32
  }
  func.func @transform_4(%arg0: i32, %arg1: i32, %arg2: i32) -> (i32, i32) {
    %c0_i32 = arith.constant 0 : i32
    return %arg0, %arg1 : i32, i32
  }
}

</mosaic_0001>

<bundles_post_ra>
// kernel: fused_matmul_bn.1
= control target key start
LH: loop header
LB: loop body
LE: loop exit
PB: predicated region body
PF: predicated region fallthrough
CT: control target
= control target key end

     0   :  { %s2384_s15 = smov 0   ;;  %s2386_s16 = smov 0   ;;  %s2800_s0 = inlined_call_operand.vmem [shape: bf16[2048,256], index: 0, kind: input, shape index: {}]   ;;  %s2801_s1 = inlined_call_operand.vmem [shape: bf16[256,128], index: 1, kind: input, shape index: {}]   ;;  %s2802_s2 = inlined_call_operand.vmem [shape: f32[1,128], index: 2, kind: input, shape index: {}]   ;;  %s2803_s3 = inlined_call_operand.vmem [shape: f32[1,128], index: 3, kind: input, shape index: {}]   ;;  %s2804_s4 = inlined_call_operand.vmem [shape: f32[2048,128], index: 4, kind: output, shape index: {}]  }
   0x1   :  { %s2388_s17 = smov 0  }
   0x2 LB: > { %s33_s18 = sadd.s32 1, %s2353_s16  ;;  %p1882_p0 = scmp.ge.s32.totalorder %s2357_s17, 1  ;;  %s2357_s17 = sphi %s2388_s17, %s14_s17   ;;  %s2353_s16 = sphi %s2386_s16, %s2806_s16   ;;  %s2349_s15 = sphi %s2384_s15, %s2805_s15  }
   0x3   : > { %p35_p1 = scmp.ge.s32.totalorder %s33_s18, 4  ;;  %p224_p2 = scmp.lt.s32.totalorder %s2357_s17, 5 }
   0x5   : > { %s2808_s18 = smov (%p35_p1, %s33_s18), 0  ;;  %p225_p3 = pnand %p1882_p0, %p224_p2 }
   0x6   : > { %s1883_s5 = sshll.u32 (!%p225_p3), %s2349_s15, 6 }
   0x7   : > { %228 = sbr.rel (%p225_p3) target bundleno = 434 (0x1b2), region = 36  ;;  %p274_p4 = scmp.lt.s32.totalorder (!%p225_p3), %s1883_s5, 255 }
   0xc   : > { %v2282_v0 = vld [vmem:[%s2801_s1 + $0x38] sm:$0xff]  ;;  %v2281_v2 = vld [vmem:[%s2801_s1 + $0x30] sm:$0xff]  ;;  %v2280_v4 = vld [vmem:[%s2801_s1 + $0x28] sm:$0xff]  ;;  %s2810_s5 = smov (!%p274_p4, %s1883_s5), 255 }
   0xd   : > { %v2290_v1 = vld [vmem:[%s2801_s1 + $0x78] sm:$0xff]  ;;  %952 = vmatpush.bf16.msra.mxu0 %v2282_v0  ;;  %2291 = vmatpush.bf16.msra.mxu2 %v2282_v0  ;;  %v2289_v3 = vld [vmem:[%s2801_s1 + $0x70] sm:$0xff]  ;;  %v2288_v5 = vld [vmem:[%s2801_s1 + $0x68] sm:$0xff]  ;;  %s2210_s21 = sshll.u32 %s2810_s5, 3 }
   0xe   : > { %1121 = vmatpush.bf16.msra.mxu1 %v2290_v1  ;;  %2299 = vmatpush.bf16.msra.mxu3 %v2290_v1  ;;  %v2279_v6 = vld [vmem:[%s2801_s1 + $0x20] sm:$0xff]  ;;  %v2278_v8 = vld [vmem:[%s2801_s1 + $0x18] sm:$0xff]  ;;  %v2277_v10 = vld [vmem:[%s2801_s1 + $0x10] sm:$0xff]  ;;  %s2452_s26 = scalar_lea.vmem %s2800_s0, %s2210_s21  ;;  %s2552_s14 = scalar_lea.vmem %s2804_s4, %s2210_s21 }
   0xf   : > { %v2287_v7 = vld [vmem:[%s2801_s1 + $0x60] sm:$0xff]  ;;  %v2286_v9 = vld [vmem:[%s2801_s1 + $0x58] sm:$0xff]  ;;  %v2285_v11 = vld [vmem:[%s2801_s1 + $0x50] sm:$0xff] }
  0x10   : > { %v2276_v12 = vld [vmem:[%s2801_s1 + $0x8] sm:$0xff]  ;;  %v2275_v14 = vld [vmem:[%s2801_s1] sm:$0xff]  ;;  %v1898_v28 = vld [vmem:[%s2452_s26 + $0x10] sm:$0xf] }
  0x11   : > { %953 = vmatpush.bf16.msra.mxu0 %v2281_v2  ;;  %2292 = vmatpush.bf16.msra.mxu2 %v2281_v2  ;;  %v2284_v13 = vld [vmem:[%s2801_s1 + $0x48] sm:$0xff]  ;;  %v2283_v15 = vld [vmem:[%s2801_s1 + $0x40] sm:$0xff]  ;;  %v2214_v29 = vld [vmem:[%s2452_s26 + $0x14] sm:$0xf0] }
  0x12   : > { %1122 = vmatpush.bf16.msra.mxu1 %v2289_v3  ;;  %2300 = vmatpush.bf16.msra.mxu3 %v2289_v3  ;;  %v1890_v16 = vld [vmem:[%s2452_s26] sm:$0xf]  ;;  %v2212_v17 = vld [vmem:[%s2452_s26 + $0x4] sm:$0xf0]  ;;  %v2211_v20 = vld [vmem:[%s2452_s26 + $0x4] sm:$0xf]  ;;  %v1899_v36 = vor.u32 %v2214_v29, %v1898_v28 }
  0x13   : > { %v2018_v18 = vld [vmem:[%s2452_s26 + $0x100] sm:$0xf]  ;;  %v2244_v19 = vld [vmem:[%s2452_s26 + $0x104] sm:$0xf0]  ;;  %v1892_v21 = vld [vmem:[%s2452_s26 + $0x8] sm:$0xf0]  ;;  %v1891_v24 = vor.u32 %v2212_v17, %v1890_v16 }
  0x14   : > { %v2243_v22 = vld [vmem:[%s2452_s26 + $0x104] sm:$0xf]  ;;  %v2020_v23 = vld [vmem:[%s2452_s26 + $0x108] sm:$0xf0]  ;;  %v2019_v25 = vor.u32 %v2244_v19, %v2018_v18  ;;  %v1895_v26 = vor.u32 %v2211_v20, %v1892_v21  ;;  %v2026_v30 = vld [vmem:[%s2452_s26 + $0x110] sm:$0xf] }
  0x15   : > { %954 = vmatpush.bf16.msra.mxu0 %v2280_v4  ;;  %2293 = vmatpush.bf16.msra.mxu2 %v2280_v4  ;;  %v2023_v27 = vor.u32 %v2243_v22, %v2020_v23  ;;  %v2246_v31 = vld [vmem:[%s2452_s26 + $0x114] sm:$0xf0]  ;;  %v2213_v32 = vld [vmem:[%s2452_s26 + $0x14] sm:$0xf]  ;;  %v1900_v33 = vld [vmem:[%s2452_s26 + $0x18] sm:$0xf0] }
  0x16   : > { %1123 = vmatpush.bf16.msra.mxu1 %v2288_v5  ;;  %2301 = vmatpush.bf16.msra.mxu3 %v2288_v5  ;;  %v2245_v34 = vld [vmem:[%s2452_s26 + $0x114] sm:$0xf]  ;;  %v2028_v35 = vld [vmem:[%s2452_s26 + $0x118] sm:$0xf0]  ;;  %v2027_v37 = vor.u32 %v2246_v31, %v2026_v30  ;;  %v1903_v38 = vor.u32 %v2213_v32, %v1900_v33  ;;  %v1906_v40 = vld [vmem:[%s2452_s26 + $0x20] sm:$0xf] }
  0x17   : > { %v2031_v39 = vor.u32 %v2245_v34, %v2028_v35  ;;  %v2216_v41 = vld [vmem:[%s2452_s26 + $0x24] sm:$0xf0]  ;;  %v2034_v42 = vld [vmem:[%s2452_s26 + $0x120] sm:$0xf]  ;;  %v2215_v44 = vld [vmem:[%s2452_s26 + $0x24] sm:$0xf] }
  0x18   : > { %v2248_v43 = vld [vmem:[%s2452_s26 + $0x124] sm:$0xf0]  ;;  %v1908_v45 = vld [vmem:[%s2452_s26 + $0x28] sm:$0xf0]  ;;  %v2247_v46 = vld [vmem:[%s2452_s26 + $0x124] sm:$0xf]  ;;  %v1907_v48 = vor.u32 %v2216_v41, %v1906_v40 }
  0x19   : > { %955 = vmatpush.bf16.msra.mxu0 %v2279_v6  ;;  %2294 = vmatpush.bf16.msra.mxu2 %v2279_v6  ;;  %v2036_v47 = vld [vmem:[%s2452_s26 + $0x128] sm:$0xf0]  ;;  %v2035_v49 = vor.u32 %v2248_v43, %v2034_v42  ;;  %v1911_v50 = vor.u32 %v2215_v44, %v1908_v45  ;;  %v1914_v52 = vld [vmem:[%s2452_s26 + $0x30] sm:$0xf]  ;;  %v2218_v53 = vld [vmem:[%s2452_s26 + $0x34] sm:$0xf0] }
  0x1a   : > { %1124 = vmatpush.bf16.msra.mxu1 %v2287_v7  ;;  %2302 = vmatpush.bf16.msra.mxu3 %v2287_v7  ;;  %v2039_v51 = vor.u32 %v2247_v46, %v2036_v47  ;;  %v2042_v54 = vld [vmem:[%s2452_s26 + $0x130] sm:$0xf]  ;;  %v2250_v55 = vld [vmem:[%s2452_s26 + $0x134] sm:$0xf0]  ;;  %v2217_v56 = vld [vmem:[%s2452_s26 + $0x34] sm:$0xf]  ;;  %v1915_v60 = vor.u32 %v2218_v53, %v1914_v52 }
  0x1b   : > { %v1916_v57 = vld [vmem:[%s2452_s26 + $0x38] sm:$0xf0]  ;;  %v2249_v58 = vld [vmem:[%s2452_s26 + $0x134] sm:$0xf]  ;;  %v2043_v61 = vor.u32 %v2250_v55, %v2042_v54  ;;  %v1922_v0 = vld [vmem:[%s2452_s26 + $0x40] sm:$0xf] }
  0x1c   : > { %v2044_v59 = vld [vmem:[%s2452_s26 + $0x138] sm:$0xf0]  ;;  %v1919_v62 = vor.u32 %v2217_v56, %v1916_v57  ;;  %v2220_v1 = vld [vmem:[%s2452_s26 + $0x44] sm:$0xf0]  ;;  %v2050_v2 = vld [vmem:[%s2452_s26 + $0x140] sm:$0xf] }
  0x1d   : > { %956 = vmatpush.bf16.msra.mxu0 %v2278_v8  ;;  %2295 = vmatpush.bf16.msra.mxu2 %v2278_v8  ;;  %v2047_v63 = vor.u32 %v2249_v58, %v2044_v59  ;;  %v2252_v3 = vld [vmem:[%s2452_s26 + $0x144] sm:$0xf0]  ;;  %v2219_v4 = vld [vmem:[%s2452_s26 + $0x44] sm:$0xf]  ;;  %v1924_v5 = vld [vmem:[%s2452_s26 + $0x48] sm:$0xf0]  ;;  %v1923_v8 = vor.u32 %v2220_v1, %v1922_v0 }
  0x1e   : > { %1125 = vmatpush.bf16.msra.mxu1 %v2286_v9  ;;  %2303 = vmatpush.bf16.msra.mxu3 %v2286_v9  ;;  %v2251_v6 = vld [vmem:[%s2452_s26 + $0x144] sm:$0xf]  ;;  %v2052_v7 = vld [vmem:[%s2452_s26 + $0x148] sm:$0xf0]  ;;  %v2051_v9 = vor.u32 %v2252_v3, %v2050_v2  ;;  %v2221_v16 = vld [vmem:[%s2452_s26 + $0x54] sm:$0xf] }
  0x1f   : > { %v1932_v17 = vld [vmem:[%s2452_s26 + $0x58] sm:$0xf0]  ;;  %v2253_v18 = vld [vmem:[%s2452_s26 + $0x154] sm:$0xf]  ;;  %v2223_v28 = vld [vmem:[%s2452_s26 + $0x64] sm:$0xf] }
  0x20   : > { %v2060_v19 = vld [vmem:[%s2452_s26 + $0x158] sm:$0xf0]  ;;  %v1935_v22 = vor.u32 %v2221_v16, %v1932_v17  ;;  %v1940_v29 = vld [vmem:[%s2452_s26 + $0x68] sm:$0xf0]  ;;  %v2255_v30 = vld [vmem:[%s2452_s26 + $0x164] sm:$0xf] }
  0x21   : > { %957 = vmatpush.bf16.msra.mxu0 %v2277_v10  ;;  %2296 = vmatpush.bf16.msra.mxu2 %v2277_v10  ;;  %v1927_v10 = vor.u32 %v2219_v4, %v1924_v5  ;;  %v2063_v23 = vor.u32 %v2253_v18, %v2060_v19  ;;  %v2068_v31 = vld [vmem:[%s2452_s26 + $0x168] sm:$0xf0]  ;;  %v1943_v34 = vor.u32 %v2223_v28, %v1940_v29  ;;  %v2225_v40 = vld [vmem:[%s2452_s26 + $0x74] sm:$0xf]  ;;  %v1948_v41 = vld [vmem:[%s2452_s26 + $0x78] sm:$0xf0] }
  0x22   : > { %1126 = vmatpush.bf16.msra.mxu1 %v2285_v11  ;;  %2304 = vmatpush.bf16.msra.mxu3 %v2285_v11  ;;  %v2055_v11 = vor.u32 %v2251_v6, %v2052_v7  ;;  %v2071_v35 = vor.u32 %v2255_v30, %v2068_v31  ;;  %v2257_v42 = vld [vmem:[%s2452_s26 + $0x174] sm:$0xf]  ;;  %v2076_v43 = vld [vmem:[%s2452_s26 + $0x178] sm:$0xf0]  ;;  %v1951_v46 = vor.u32 %v2225_v40, %v1948_v41  ;;  %v2227_v52 = vld [vmem:[%s2452_s26 + $0x84] sm:$0xf] }
  0x23   : > { %v2079_v47 = vor.u32 %v2257_v42, %v2076_v43  ;;  %v1956_v53 = vld [vmem:[%s2452_s26 + $0x88] sm:$0xf0]  ;;  %v2259_v54 = vld [vmem:[%s2452_s26 + $0x184] sm:$0xf]  ;;  %v2538_v59 = vld [vmem:[%s2802_s2] ss:$0 sm:$0xff] }
  0x24   : > { %v2084_v55 = vld [vmem:[%s2452_s26 + $0x188] sm:$0xf0]  ;;  %v2543_v0 = vld [vmem:[%s2803_s3] ss:$0 sm:$0xff]  ;;  %v2262_v16 = vld [vmem:[%s2452_s26 + $0x194] sm:$0xf0] }
  0x25   : > { %958 = vmatpush.bf16.msra.mxu0 %v2276_v12  ;;  %2297 = vmatpush.bf16.msra.mxu2 %v2276_v12  ;;  %v1930_v12 = vld [vmem:[%s2452_s26 + $0x50] sm:$0xf]  ;;  %v2229_v17 = vld [vmem:[%s2452_s26 + $0x94] sm:$0xf]  ;;  %v1964_v18 = vld [vmem:[%s2452_s26 + $0x98] sm:$0xf0] }
  0x26   : > { %1127 = vmatpush.bf16.msra.mxu1 %v2284_v13  ;;  %2305 = vmatpush.bf16.msra.mxu3 %v2284_v13  ;;  %v2222_v13 = vld [vmem:[%s2452_s26 + $0x54] sm:$0xf0]  ;;  %v2261_v19 = vld [vmem:[%s2452_s26 + $0x194] sm:$0xf]  ;;  %v1967_v30 = vor.u32 %v2229_v17, %v1964_v18 }
  0x27   : > { %v1931_v20 = vor.u32 %v2222_v13, %v1930_v12  ;;  %v2230_v12 = vld [vmem:[%s2452_s26 + $0x94] sm:$0xf0] }
  0x29   : > { %959 = vmatpush.bf16.msra.mxu0 %v2275_v14  ;;  %2298 = vmatpush.bf16.msra.mxu2 %v2275_v14  ;;  %v2058_v14 = vld [vmem:[%s2452_s26 + $0x150] sm:$0xf] }
  0x2a   : > { %1128 = vmatpush.bf16.msra.mxu1 %v2283_v15  ;;  %2306 = vmatpush.bf16.msra.mxu3 %v2283_v15  ;;  %v2254_v15 = vld [vmem:[%s2452_s26 + $0x154] sm:$0xf0] }
  0x2b   : > { %v2059_v21 = vor.u32 %v2254_v15, %v2058_v14  ;;  %v2090_v15 = vld [vmem:[%s2452_s26 + $0x190] sm:$0xf] }
  0x2c   : > { %960 = vmatmul.bf16.vlgmr.msra.gmra.mxu0 %v1891_v24  ;;  %1040 = vmatmul.bf16.vlgmr.msra.gmra.mxu2 %v2019_v25  ;;  %v1938_v24 = vld [vmem:[%s2452_s26 + $0x60] sm:$0xf]  ;;  %v2224_v25 = vld [vmem:[%s2452_s26 + $0x64] sm:$0xf0] }
  0x2d   : > { %1129 = vmatmul.bf16.vlgmr.msra.gmra.mxu1 %v1895_v26  ;;  %1209 = vmatmul.bf16.vlgmr.msra.gmra.mxu3 %v2023_v27  ;;  %v2066_v26 = vld [vmem:[%s2452_s26 + $0x160] sm:$0xf]  ;;  %v2256_v27 = vld [vmem:[%s2452_s26 + $0x164] sm:$0xf0]  ;;  %v1939_v32 = vor.u32 %v2224_v25, %v1938_v24 }
  0x2e   : > { %v2067_v33 = vor.u32 %v2256_v27, %v2066_v26  ;;  %v2091_v26 = vor.u32 %v2262_v16, %v2090_v15 }
  0x3c   : > { %965 = vmatmul.bf16.gmra.mxu0 %v1899_v36  ;;  %1045 = vmatmul.bf16.gmra.mxu2 %v2027_v37  ;;  %v1946_v36 = vld [vmem:[%s2452_s26 + $0x70] sm:$0xf]  ;;  %v2226_v37 = vld [vmem:[%s2452_s26 + $0x74] sm:$0xf0] }
  0x3d   : > { %1134 = vmatmul.bf16.gmra.mxu1 %v1903_v38  ;;  %1214 = vmatmul.bf16.gmra.mxu3 %v2031_v39  ;;  %v2074_v38 = vld [vmem:[%s2452_s26 + $0x170] sm:$0xf]  ;;  %v2258_v39 = vld [vmem:[%s2452_s26 + $0x174] sm:$0xf0]  ;;  %v1947_v44 = vor.u32 %v2226_v37, %v1946_v36 }
  0x3e   : > { %v2075_v45 = vor.u32 %v2258_v39, %v2074_v38 }
  0x4c   : > { %970 = vmatmul.bf16.gmra.mxu0 %v1907_v48  ;;  %1050 = vmatmul.bf16.gmra.mxu2 %v2035_v49  ;;  %v1954_v48 = vld [vmem:[%s2452_s26 + $0x80] sm:$0xf]  ;;  %v2228_v49 = vld [vmem:[%s2452_s26 + $0x84] sm:$0xf0] }
  0x4d   : > { %1139 = vmatmul.bf16.gmra.mxu1 %v1911_v50  ;;  %1219 = vmatmul.bf16.gmra.mxu3 %v2039_v51  ;;  %v2082_v50 = vld [vmem:[%s2452_s26 + $0x180] sm:$0xf]  ;;  %v2260_v51 = vld [vmem:[%s2452_s26 + $0x184] sm:$0xf0]  ;;  %v1955_v56 = vor.u32 %v2228_v49, %v1954_v48 }
  0x4e   : > { %v2083_v57 = vor.u32 %v2260_v51, %v2082_v50  ;;  %v2232_v48 = vld [vmem:[%s2452_s26 + $0xa4] sm:$0xf0]  ;;  %v2098_v51 = vld [vmem:[%s2452_s26 + $0x1a0] sm:$0xf] }
  0x5c   : > { %975 = vmatmul.bf16.gmra.mxu0 %v1915_v60  ;;  %1055 = vmatmul.bf16.gmra.mxu2 %v2043_v61  ;;  %v1959_v60 = vor.u32 %v2227_v52, %v1956_v53  ;;  %v2087_v61 = vor.u32 %v2259_v54, %v2084_v55  ;;  %v2264_v52 = vld [vmem:[%s2452_s26 + $0x1a4] sm:$0xf0]  ;;  %v2231_v53 = vld [vmem:[%s2452_s26 + $0xa4] sm:$0xf]  ;;  %v1972_v54 = vld [vmem:[%s2452_s26 + $0xa8] sm:$0xf0] }
  0x5d   : > { %1144 = vmatmul.bf16.gmra.mxu1 %v1919_v62  ;;  %1224 = vmatmul.bf16.gmra.mxu3 %v2047_v63  ;;  %v2263_v55 = vld [vmem:[%s2452_s26 + $0x1a4] sm:$0xf] }
  0x6c   : > { %980 = vmatmul.bf16.gmra.mxu0 %v1923_v8  ;;  %1060 = vmatmul.bf16.gmra.mxu2 %v2051_v9 }
  0x6d   : > { %1149 = vmatmul.bf16.gmra.mxu1 %v1927_v10  ;;  %1229 = vmatmul.bf16.gmra.mxu3 %v2055_v11  ;;  %v1962_v11 = vld [vmem:[%s2452_s26 + $0x90] sm:$0xf] }
  0x6e   : > { %v1963_v25 = vor.u32 %v2230_v12, %v1962_v11 }
  0x7c   : > { %985 = vmatmul.bf16.gmra.mxu0 %v1931_v20  ;;  %1065 = vmatmul.bf16.gmra.mxu2 %v2059_v21  ;;  %v2092_v20 = vld [vmem:[%s2452_s26 + $0x198] sm:$0xf0] }
  0x7d   : > { %1154 = vmatmul.bf16.gmra.mxu1 %v1935_v22  ;;  %1234 = vmatmul.bf16.gmra.mxu3 %v2063_v23  ;;  %v2095_v31 = vor.u32 %v2261_v19, %v2092_v20 }
  0x8c   : > { %990 = vmatmul.bf16.gmra.mxu0 %v1939_v32  ;;  %1070 = vmatmul.bf16.gmra.mxu2 %v2067_v33 }
  0x8d   : > { %1159 = vmatmul.bf16.gmra.mxu1 %v1943_v34  ;;  %1239 = vmatmul.bf16.gmra.mxu3 %v2071_v35 }
  0x9c   : > { %995 = vmatmul.bf16.gmra.mxu0 %v1947_v44  ;;  %1075 = vmatmul.bf16.gmra.mxu2 %v2075_v45 }
  0x9d   : > { %1164 = vmatmul.bf16.gmra.mxu1 %v1951_v46  ;;  %1244 = vmatmul.bf16.gmra.mxu3 %v2079_v47  ;;  %v1970_v47 = vld [vmem:[%s2452_s26 + $0xa0] sm:$0xf] }
  0xa9   : > { %v961_v58 = vpop.f32.mrf.mxu0 }
  0xaa   : > { %v1130_v62 = vpop.f32.mrf.mxu1 }
  0xab   : > { %v1131_v63 = vadd.f32 %v1130_v62, %v961_v58  ;;  %v1971_v62 = vor.u32 %v2232_v48, %v1970_v47 }
  0xac   : > { %1000 = vmatmul.bf16.gmra.mxu0 %v1955_v56  ;;  %1080 = vmatmul.bf16.gmra.mxu2 %v2083_v57  ;;  %v2100_v56 = vld [vmem:[%s2452_s26 + $0x1a8] sm:$0xf0] }
  0xad   : > { %v1489_v1 = vmul.f32 %v2538_v59, %v1131_v63  ;;  %1169 = vmatmul.bf16.gmra.mxu1 %v1959_v60  ;;  %1249 = vmatmul.bf16.gmra.mxu3 %v2087_v61  ;;  %v2099_v63 = vor.u32 %v2264_v52, %v2098_v51 }
  0xaf   : > { %v1557_v2 = vadd.f32 %v2543_v0, %v1489_v1  ;;  %v1041_v3 = vpop.f32.mrf.mxu2 }
  0xb0   : > { %v1210_v4 = vpop.f32.mrf.mxu3 }
  0xb1   : > { %v1621_v5 = vmax.f32 %v1557_v2, 0.0  ;;  %v1211_v6 = vadd.f32 %v1210_v4, %v1041_v3  ;;  %v963_v7 = vpop.f32.mrf.mxu0  ;;  %v1975_v4 = vor.u32 %v2231_v53, %v1972_v54 }
  0xb2   : > { %v1132_v8 = vpop.f32.mrf.mxu1 }
  0xb3   : > { %1685 = vst [vmem:[%s2552_s14] sm:$0xff] %v1621_v5  ;;  %v1521_v9 = vmul.f32 %v2538_v59, %v1211_v6  ;;  %v1133_v10 = vadd.f32 %v1132_v8, %v963_v7  ;;  %v2103_v5 = vor.u32 %v2263_v55, %v2100_v56 }
  0xb5   : > { %v1589_v13 = vadd.f32 %v2543_v0, %v1521_v9  ;;  %v1490_v14 = vmul.f32 %v2538_v59, %v1133_v10 }
  0xb7   : > { %v1653_v21 = vmax.f32 %v1589_v13, 0.0  ;;  %v1558_v22 = vadd.f32 %v2543_v0, %v1490_v14  ;;  %v1043_v23 = vpop.f32.mrf.mxu2 }
  0xb8   : > { %v1212_v24 = vpop.f32.mrf.mxu3 }
  0xb9   : > { %1717 = vst [vmem:[%s2552_s14 + $0x100] sm:$0xff] %v1653_v21  ;;  %v1622_v27 = vmax.f32 %v1558_v22, 0.0  ;;  %v1213_v28 = vadd.f32 %v1212_v24, %v1043_v23  ;;  %v966_v29 = vpop.f32.mrf.mxu0  ;;  %v1978_v21 = vld [vmem:[%s2452_s26 + $0xb0] sm:$0xf]  ;;  %v2234_v22 = vld [vmem:[%s2452_s26 + $0xb4] sm:$0xf0] }
  0xba   : > { %v1135_v32 = vpop.f32.mrf.mxu1 }
  0xbb   : > { %1686 = vst [vmem:[%s2552_s14 + $0x8] sm:$0xff] %v1622_v27  ;;  %v1522_v33 = vmul.f32 %v2538_v59, %v1213_v28  ;;  %v1136_v34 = vadd.f32 %v1135_v32, %v966_v29  ;;  %v2233_v27 = vld [vmem:[%s2452_s26 + $0xb4] sm:$0xf]  ;;  %v1980_v28 = vld [vmem:[%s2452_s26 + $0xb8] sm:$0xf0] }
  0xbc   : > { %1005 = vmatmul.bf16.gmra.mxu0 %v1963_v25  ;;  %1085 = vmatmul.bf16.gmra.mxu2 %v2091_v26  ;;  %v2106_v25 = vld [vmem:[%s2452_s26 + $0x1b0] sm:$0xf]  ;;  %v2266_v26 = vld [vmem:[%s2452_s26 + $0x1b4] sm:$0xf0]  ;;  %v2265_v29 = vld [vmem:[%s2452_s26 + $0x1b4] sm:$0xf] }
  0xbd   : > { %v1590_v35 = vadd.f32 %v2543_v0, %v1522_v33  ;;  %v1491_v36 = vmul.f32 %v2538_v59, %v1136_v34  ;;  %1174 = vmatmul.bf16.gmra.mxu1 %v1967_v30  ;;  %1254 = vmatmul.bf16.gmra.mxu3 %v2095_v31  ;;  %v2108_v30 = vld [vmem:[%s2452_s26 + $0x1b8] sm:$0xf0] }
  0xbf   : > { %v1654_v37 = vmax.f32 %v1590_v35, 0.0  ;;  %v1559_v38 = vadd.f32 %v2543_v0, %v1491_v36  ;;  %v1046_v39 = vpop.f32.mrf.mxu2  ;;  %v1979_v35 = vor.u32 %v2234_v22, %v1978_v21  ;;  %v2107_v36 = vor.u32 %v2266_v26, %v2106_v25 }
  0xc0   : > { %v1215_v40 = vpop.f32.mrf.mxu3 }
  0xc1   : > { %1718 = vst [vmem:[%s2552_s14 + $0x108] sm:$0xff] %v1654_v37  ;;  %v1623_v41 = vmax.f32 %v1559_v38, 0.0  ;;  %v1216_v42 = vadd.f32 %v1215_v40, %v1046_v39  ;;  %v968_v43 = vpop.f32.mrf.mxu0  ;;  %v1983_v40 = vor.u32 %v2233_v27, %v1980_v28 }
  0xc2   : > { %v1137_v44 = vpop.f32.mrf.mxu1 }
  0xc3   : > { %1687 = vst [vmem:[%s2552_s14 + $0x10] sm:$0xff] %v1623_v41  ;;  %v1523_v45 = vmul.f32 %v2538_v59, %v1216_v42  ;;  %v1138_v46 = vadd.f32 %v1137_v44, %v968_v43  ;;  %v2111_v41 = vor.u32 %v2265_v29, %v2108_v30 }
  0xc5   : > { %v1591_v49 = vadd.f32 %v2543_v0, %v1523_v45  ;;  %v1492_v50 = vmul.f32 %v2538_v59, %v1138_v46 }
  0xc7   : > { %v1655_v57 = vmax.f32 %v1591_v49, 0.0  ;;  %v1560_v58 = vadd.f32 %v2543_v0, %v1492_v50  ;;  %v1048_v60 = vpop.f32.mrf.mxu2 }
  0xc8   : > { %v1217_v61 = vpop.f32.mrf.mxu3 }
  0xc9   : > { %1719 = vst [vmem:[%s2552_s14 + $0x110] sm:$0xff] %v1655_v57  ;;  %v1624_v1 = vmax.f32 %v1560_v58, 0.0  ;;  %v1218_v2 = vadd.f32 %v1217_v61, %v1048_v60  ;;  %v971_v3 = vpop.f32.mrf.mxu0  ;;  %v1986_v57 = vld [vmem:[%s2452_s26 + $0xc0] sm:$0xf]  ;;  %v2236_v58 = vld [vmem:[%s2452_s26 + $0xc4] sm:$0xf0] }
  0xca   : > { %v1140_v6 = vpop.f32.mrf.mxu1 }
  0xcb   : > { %1688 = vst [vmem:[%s2552_s14 + $0x18] sm:$0xff] %v1624_v1  ;;  %v1524_v7 = vmul.f32 %v2538_v59, %v1218_v2  ;;  %v1141_v8 = vadd.f32 %v1140_v6, %v971_v3  ;;  %v2235_v1 = vld [vmem:[%s2452_s26 + $0xc4] sm:$0xf]  ;;  %v1988_v2 = vld [vmem:[%s2452_s26 + $0xc8] sm:$0xf0] }
  0xcc   : > { %1010 = vmatmul.bf16.gmra.mxu0 %v1971_v62  ;;  %1090 = vmatmul.bf16.gmra.mxu2 %v2099_v63  ;;  %v2114_v62 = vld [vmem:[%s2452_s26 + $0x1c0] sm:$0xf]  ;;  %v2268_v63 = vld [vmem:[%s2452_s26 + $0x1c4] sm:$0xf0]  ;;  %v2267_v3 = vld [vmem:[%s2452_s26 + $0x1c4] sm:$0xf] }
  0xcd   : > { %v1592_v9 = vadd.f32 %v2543_v0, %v1524_v7  ;;  %v1493_v10 = vmul.f32 %v2538_v59, %v1141_v8  ;;  %1179 = vmatmul.bf16.gmra.mxu1 %v1975_v4  ;;  %1259 = vmatmul.bf16.gmra.mxu3 %v2103_v5  ;;  %v2116_v4 = vld [vmem:[%s2452_s26 + $0x1c8] sm:$0xf0] }
  0xcf   : > { %v1656_v11 = vmax.f32 %v1592_v9, 0.0  ;;  %v1561_v12 = vadd.f32 %v2543_v0, %v1493_v10  ;;  %v1051_v13 = vpop.f32.mrf.mxu2  ;;  %v1987_v9 = vor.u32 %v2236_v58, %v1986_v57  ;;  %v2115_v10 = vor.u32 %v2268_v63, %v2114_v62 }
  0xd0   : > { %v1220_v14 = vpop.f32.mrf.mxu3 }
  0xd1   : > { %1720 = vst [vmem:[%s2552_s14 + $0x118] sm:$0xff] %v1656_v11  ;;  %v1625_v15 = vmax.f32 %v1561_v12, 0.0  ;;  %v1221_v16 = vadd.f32 %v1220_v14, %v1051_v13  ;;  %v973_v17 = vpop.f32.mrf.mxu0  ;;  %v1991_v14 = vor.u32 %v2235_v1, %v1988_v2 }
  0xd2   : > { %v1142_v18 = vpop.f32.mrf.mxu1 }
  0xd3   : > { %1689 = vst [vmem:[%s2552_s14 + $0x20] sm:$0xff] %v1625_v15  ;;  %v1525_v19 = vmul.f32 %v2538_v59, %v1221_v16  ;;  %v1143_v20 = vadd.f32 %v1142_v18, %v973_v17  ;;  %v2119_v15 = vor.u32 %v2267_v3, %v2116_v4 }
  0xd5   : > { %v1593_v23 = vadd.f32 %v2543_v0, %v1525_v19  ;;  %v1494_v24 = vmul.f32 %v2538_v59, %v1143_v20 }
  0xd7   : > { %v1657_v31 = vmax.f32 %v1593_v23, 0.0  ;;  %v1562_v32 = vadd.f32 %v2543_v0, %v1494_v24  ;;  %v1053_v33 = vpop.f32.mrf.mxu2 }
  0xd8   : > { %v1222_v34 = vpop.f32.mrf.mxu3 }
  0xd9   : > { %1721 = vst [vmem:[%s2552_s14 + $0x120] sm:$0xff] %v1657_v31  ;;  %v1626_v37 = vmax.f32 %v1562_v32, 0.0  ;;  %v1223_v38 = vadd.f32 %v1222_v34, %v1053_v33  ;;  %v976_v39 = vpop.f32.mrf.mxu0  ;;  %v1994_v31 = vld [vmem:[%s2452_s26 + $0xd0] sm:$0xf]  ;;  %v2238_v32 = vld [vmem:[%s2452_s26 + $0xd4] sm:$0xf0] }
  0xda   : > { %v1145_v42 = vpop.f32.mrf.mxu1 }
  0xdb   : > { %1690 = vst [vmem:[%s2552_s14 + $0x28] sm:$0xff] %v1626_v37  ;;  %v1526_v43 = vmul.f32 %v2538_v59, %v1223_v38  ;;  %v1146_v44 = vadd.f32 %v1145_v42, %v976_v39  ;;  %v2237_v37 = vld [vmem:[%s2452_s26 + $0xd4] sm:$0xf]  ;;  %v1996_v38 = vld [vmem:[%s2452_s26 + $0xd8] sm:$0xf0] }
  0xdc   : > { %1015 = vmatmul.bf16.gmra.mxu0 %v1979_v35  ;;  %1095 = vmatmul.bf16.gmra.mxu2 %v2107_v36  ;;  %v2122_v35 = vld [vmem:[%s2452_s26 + $0x1d0] sm:$0xf]  ;;  %v2270_v36 = vld [vmem:[%s2452_s26 + $0x1d4] sm:$0xf0]  ;;  %v2269_v39 = vld [vmem:[%s2452_s26 + $0x1d4] sm:$0xf] }
  0xdd   : > { %v1594_v45 = vadd.f32 %v2543_v0, %v1526_v43  ;;  %v1495_v46 = vmul.f32 %v2538_v59, %v1146_v44  ;;  %1184 = vmatmul.bf16.gmra.mxu1 %v1983_v40  ;;  %1264 = vmatmul.bf16.gmra.mxu3 %v2111_v41  ;;  %v2124_v40 = vld [vmem:[%s2452_s26 + $0x1d8] sm:$0xf0] }
  0xdf   : > { %v1658_v47 = vmax.f32 %v1594_v45, 0.0  ;;  %v1563_v48 = vadd.f32 %v2543_v0, %v1495_v46  ;;  %v1056_v49 = vpop.f32.mrf.mxu2  ;;  %v1995_v45 = vor.u32 %v2238_v32, %v1994_v31  ;;  %v2123_v46 = vor.u32 %v2270_v36, %v2122_v35 }
  0xe0   : > { %v1225_v50 = vpop.f32.mrf.mxu3 }
  0xe1   : > { %1722 = vst [vmem:[%s2552_s14 + $0x128] sm:$0xff] %v1658_v47  ;;  %v1627_v51 = vmax.f32 %v1563_v48, 0.0  ;;  %v1226_v52 = vadd.f32 %v1225_v50, %v1056_v49  ;;  %v978_v53 = vpop.f32.mrf.mxu0  ;;  %v1999_v50 = vor.u32 %v2237_v37, %v1996_v38 }
  0xe2   : > { %v1147_v54 = vpop.f32.mrf.mxu1 }
  0xe3   : > { %1691 = vst [vmem:[%s2552_s14 + $0x30] sm:$0xff] %v1627_v51  ;;  %v1527_v55 = vmul.f32 %v2538_v59, %v1226_v52  ;;  %v1148_v56 = vadd.f32 %v1147_v54, %v978_v53  ;;  %v2127_v51 = vor.u32 %v2269_v39, %v2124_v40 }
  0xe5   : > { %v1595_v60 = vadd.f32 %v2543_v0, %v1527_v55  ;;  %v1496_v61 = vmul.f32 %v2538_v59, %v1148_v56 }
  0xe7   : > { %v1659_v5 = vmax.f32 %v1595_v60, 0.0  ;;  %v1564_v6 = vadd.f32 %v2543_v0, %v1496_v61  ;;  %v1058_v7 = vpop.f32.mrf.mxu2 }
  0xe8   : > { %v1227_v8 = vpop.f32.mrf.mxu3 }
  0xe9   : > { %1723 = vst [vmem:[%s2552_s14 + $0x130] sm:$0xff] %v1659_v5  ;;  %v1628_v11 = vmax.f32 %v1564_v6, 0.0  ;;  %v1228_v12 = vadd.f32 %v1227_v8, %v1058_v7  ;;  %v981_v13 = vpop.f32.mrf.mxu0  ;;  %v2002_v5 = vld [vmem:[%s2452_s26 + $0xe0] sm:$0xf]  ;;  %v2240_v6 = vld [vmem:[%s2452_s26 + $0xe4] sm:$0xf0] }
  0xea   : > { %v1150_v16 = vpop.f32.mrf.mxu1 }
  0xeb   : > { %1692 = vst [vmem:[%s2552_s14 + $0x38] sm:$0xff] %v1628_v11  ;;  %v1528_v17 = vmul.f32 %v2538_v59, %v1228_v12  ;;  %v1151_v18 = vadd.f32 %v1150_v16, %v981_v13  ;;  %v2239_v11 = vld [vmem:[%s2452_s26 + $0xe4] sm:$0xf]  ;;  %v2004_v12 = vld [vmem:[%s2452_s26 + $0xe8] sm:$0xf0] }
  0xec   : > { %1020 = vmatmul.bf16.gmra.mxu0 %v1987_v9  ;;  %1100 = vmatmul.bf16.gmra.mxu2 %v2115_v10  ;;  %v2130_v9 = vld [vmem:[%s2452_s26 + $0x1e0] sm:$0xf]  ;;  %v2272_v10 = vld [vmem:[%s2452_s26 + $0x1e4] sm:$0xf0]  ;;  %v2271_v13 = vld [vmem:[%s2452_s26 + $0x1e4] sm:$0xf] }
  0xed   : > { %v1596_v19 = vadd.f32 %v2543_v0, %v1528_v17  ;;  %v1497_v20 = vmul.f32 %v2538_v59, %v1151_v18  ;;  %1189 = vmatmul.bf16.gmra.mxu1 %v1991_v14  ;;  %1269 = vmatmul.bf16.gmra.mxu3 %v2119_v15  ;;  %v2132_v14 = vld [vmem:[%s2452_s26 + $0x1e8] sm:$0xf0] }
  0xef   : > { %v1660_v21 = vmax.f32 %v1596_v19, 0.0  ;;  %v1565_v22 = vadd.f32 %v2543_v0, %v1497_v20  ;;  %v1061_v23 = vpop.f32.mrf.mxu2  ;;  %v2003_v19 = vor.u32 %v2240_v6, %v2002_v5  ;;  %v2131_v20 = vor.u32 %v2272_v10, %v2130_v9 }
  0xf0   : > { %v1230_v24 = vpop.f32.mrf.mxu3 }
  0xf1   : > { %1724 = vst [vmem:[%s2552_s14 + $0x138] sm:$0xff] %v1660_v21  ;;  %v1629_v25 = vmax.f32 %v1565_v22, 0.0  ;;  %v1231_v26 = vadd.f32 %v1230_v24, %v1061_v23  ;;  %v983_v27 = vpop.f32.mrf.mxu0  ;;  %v2007_v24 = vor.u32 %v2239_v11, %v2004_v12 }
  0xf2   : > { %v1152_v28 = vpop.f32.mrf.mxu1 }
  0xf3   : > { %1693 = vst [vmem:[%s2552_s14 + $0x40] sm:$0xff] %v1629_v25  ;;  %v1529_v29 = vmul.f32 %v2538_v59, %v1231_v26  ;;  %v1153_v30 = vadd.f32 %v1152_v28, %v983_v27  ;;  %v2135_v25 = vor.u32 %v2271_v13, %v2132_v14 }
  0xf5   : > { %v1597_v33 = vadd.f32 %v2543_v0, %v1529_v29  ;;  %v1498_v34 = vmul.f32 %v2538_v59, %v1153_v30 }
  0xf7   : > { %v1661_v41 = vmax.f32 %v1597_v33, 0.0  ;;  %v1566_v42 = vadd.f32 %v2543_v0, %v1498_v34  ;;  %v1063_v43 = vpop.f32.mrf.mxu2 }
  0xf8   : > { %v1232_v44 = vpop.f32.mrf.mxu3 }
  0xf9   : > { %1725 = vst [vmem:[%s2552_s14 + $0x140] sm:$0xff] %v1661_v41  ;;  %v1630_v47 = vmax.f32 %v1566_v42, 0.0  ;;  %v1233_v48 = vadd.f32 %v1232_v44, %v1063_v43  ;;  %v986_v49 = vpop.f32.mrf.mxu0  ;;  %v2010_v41 = vld [vmem:[%s2452_s26 + $0xf0] sm:$0xf]  ;;  %v2242_v42 = vld [vmem:[%s2452_s26 + $0xf4] sm:$0xf0] }
  0xfa   : > { %v1155_v52 = vpop.f32.mrf.mxu1 }
  0xfb   : > { %1694 = vst [vmem:[%s2552_s14 + $0x48] sm:$0xff] %v1630_v47  ;;  %v1530_v53 = vmul.f32 %v2538_v59, %v1233_v48  ;;  %v1156_v54 = vadd.f32 %v1155_v52, %v986_v49  ;;  %v2241_v47 = vld [vmem:[%s2452_s26 + $0xf4] sm:$0xf]  ;;  %v2012_v48 = vld [vmem:[%s2452_s26 + $0xf8] sm:$0xf0] }
  0xfc   : > { %1025 = vmatmul.bf16.gmra.mxu0 %v1995_v45  ;;  %1105 = vmatmul.bf16.gmra.mxu2 %v2123_v46  ;;  %v2138_v45 = vld [vmem:[%s2452_s26 + $0x1f0] sm:$0xf]  ;;  %v2274_v46 = vld [vmem:[%s2452_s26 + $0x1f4] sm:$0xf0]  ;;  %v2273_v49 = vld [vmem:[%s2452_s26 + $0x1f4] sm:$0xf] }
  0xfd   : > { %v1598_v55 = vadd.f32 %v2543_v0, %v1530_v53  ;;  %v1499_v56 = vmul.f32 %v2538_v59, %v1156_v54  ;;  %1194 = vmatmul.bf16.gmra.mxu1 %v1999_v50  ;;  %1274 = vmatmul.bf16.gmra.mxu3 %v2127_v51  ;;  %v2140_v50 = vld [vmem:[%s2452_s26 + $0x1f8] sm:$0xf0] }
  0xff   : > { %v1662_v57 = vmax.f32 %v1598_v55, 0.0  ;;  %v1567_v58 = vadd.f32 %v2543_v0, %v1499_v56  ;;  %v1066_v60 = vpop.f32.mrf.mxu2  ;;  %v2011_v55 = vor.u32 %v2242_v42, %v2010_v41  ;;  %v2139_v56 = vor.u32 %v2274_v46, %v2138_v45 }
 0x100   : > { %v1235_v61 = vpop.f32.mrf.mxu3 }
 0x101   : > { %1726 = vst [vmem:[%s2552_s14 + $0x148] sm:$0xff] %v1662_v57  ;;  %v1631_v62 = vmax.f32 %v1567_v58, 0.0  ;;  %v1236_v63 = vadd.f32 %v1235_v61, %v1066_v60  ;;  %v988_v1 = vpop.f32.mrf.mxu0  ;;  %v2015_v61 = vor.u32 %v2241_v47, %v2012_v48 }
 0x102   : > { %v1157_v2 = vpop.f32.mrf.mxu1 }
 0x103   : > { %1695 = vst [vmem:[%s2552_s14 + $0x50] sm:$0xff] %v1631_v62  ;;  %v1531_v3 = vmul.f32 %v2538_v59, %v1236_v63  ;;  %v1158_v4 = vadd.f32 %v1157_v2, %v988_v1  ;;  %v2143_v62 = vor.u32 %v2273_v49, %v2140_v50 }
 0x105   : > { %v1599_v7 = vadd.f32 %v2543_v0, %v1531_v3  ;;  %v1500_v8 = vmul.f32 %v2538_v59, %v1158_v4 }
 0x107   : > { %v1663_v15 = vmax.f32 %v1599_v7, 0.0  ;;  %v1568_v16 = vadd.f32 %v2543_v0, %v1500_v8  ;;  %v1068_v17 = vpop.f32.mrf.mxu2 }
 0x108   : > { %v1237_v18 = vpop.f32.mrf.mxu3 }
 0x109   : > { %1727 = vst [vmem:[%s2552_s14 + $0x150] sm:$0xff] %v1663_v15  ;;  %v1632_v21 = vmax.f32 %v1568_v16, 0.0  ;;  %v1238_v22 = vadd.f32 %v1237_v18, %v1068_v17  ;;  %v991_v23 = vpop.f32.mrf.mxu0 }
 0x10a   : > { %v1160_v26 = vpop.f32.mrf.mxu1 }
 0x10b   : > { %1696 = vst [vmem:[%s2552_s14 + $0x58] sm:$0xff] %v1632_v21  ;;  %v1532_v27 = vmul.f32 %v2538_v59, %v1238_v22  ;;  %v1161_v28 = vadd.f32 %v1160_v26, %v991_v23 }
 0x10c   : > { %1030 = vmatmul.bf16.gmra.mxu0 %v2003_v19  ;;  %1110 = vmatmul.bf16.gmra.mxu2 %v2131_v20 }
 0x10d   : > { %v1600_v29 = vadd.f32 %v2543_v0, %v1532_v27  ;;  %v1501_v30 = vmul.f32 %v2538_v59, %v1161_v28  ;;  %1199 = vmatmul.bf16.gmra.mxu1 %v2007_v24  ;;  %1279 = vmatmul.bf16.gmra.mxu3 %v2135_v25 }
 0x10f   : > { %v1664_v31 = vmax.f32 %v1600_v29, 0.0  ;;  %v1569_v32 = vadd.f32 %v2543_v0, %v1501_v30  ;;  %v1071_v33 = vpop.f32.mrf.mxu2 }
 0x110   : > { %v1240_v34 = vpop.f32.mrf.mxu3 }
 0x111   : > { %1728 = vst [vmem:[%s2552_s14 + $0x158] sm:$0xff] %v1664_v31  ;;  %v1633_v35 = vmax.f32 %v1569_v32, 0.0  ;;  %v1241_v36 = vadd.f32 %v1240_v34, %v1071_v33  ;;  %v993_v37 = vpop.f32.mrf.mxu0 }
 0x112   : > { %v1162_v38 = vpop.f32.mrf.mxu1 }
 0x113   : > { %1697 = vst [vmem:[%s2552_s14 + $0x60] sm:$0xff] %v1633_v35  ;;  %v1533_v39 = vmul.f32 %v2538_v59, %v1241_v36  ;;  %v1163_v40 = vadd.f32 %v1162_v38, %v993_v37 }
 0x115   : > { %v1601_v43 = vadd.f32 %v2543_v0, %v1533_v39  ;;  %v1502_v44 = vmul.f32 %v2538_v59, %v1163_v40 }
 0x117   : > { %v1665_v51 = vmax.f32 %v1601_v43, 0.0  ;;  %v1570_v52 = vadd.f32 %v2543_v0, %v1502_v44  ;;  %v1073_v53 = vpop.f32.mrf.mxu2 }
 0x118   : > { %v1242_v54 = vpop.f32.mrf.mxu3 }
 0x119   : > { %1729 = vst [vmem:[%s2552_s14 + $0x160] sm:$0xff] %v1665_v51  ;;  %v1634_v57 = vmax.f32 %v1570_v52, 0.0  ;;  %v1243_v58 = vadd.f32 %v1242_v54, %v1073_v53  ;;  %v996_v60 = vpop.f32.mrf.mxu0 }
 0x11a   : > { %v1165_v63 = vpop.f32.mrf.mxu1 }
 0x11b   : > { %1698 = vst [vmem:[%s2552_s14 + $0x68] sm:$0xff] %v1634_v57  ;;  %v1534_v1 = vmul.f32 %v2538_v59, %v1243_v58  ;;  %v1166_v2 = vadd.f32 %v1165_v63, %v996_v60 }
 0x11c   : > { %1035 = vmatmul.bf16.gmra.mxu0 %v2011_v55  ;;  %1115 = vmatmul.bf16.gmra.mxu2 %v2139_v56 }
 0x11d   : > { %v1602_v3 = vadd.f32 %v2543_v0, %v1534_v1  ;;  %v1503_v4 = vmul.f32 %v2538_v59, %v1166_v2  ;;  %1204 = vmatmul.bf16.gmra.mxu1 %v2015_v61  ;;  %1284 = vmatmul.bf16.gmra.mxu3 %v2143_v62 }
 0x11f   : > { %v1666_v5 = vmax.f32 %v1602_v3, 0.0  ;;  %v1571_v6 = vadd.f32 %v2543_v0, %v1503_v4  ;;  %v1076_v7 = vpop.f32.mrf.mxu2 }
 0x120   : > { %v1245_v8 = vpop.f32.mrf.mxu3 }
 0x121   : > { %1730 = vst [vmem:[%s2552_s14 + $0x168] sm:$0xff] %v1666_v5  ;;  %v1635_v9 = vmax.f32 %v1571_v6, 0.0  ;;  %v1246_v10 = vadd.f32 %v1245_v8, %v1076_v7  ;;  %v998_v11 = vpop.f32.mrf.mxu0 }
 0x122   : > { %v1167_v12 = vpop.f32.mrf.mxu1 }
 0x123   : > { %1699 = vst [vmem:[%s2552_s14 + $0x70] sm:$0xff] %v1635_v9  ;;  %v1535_v13 = vmul.f32 %v2538_v59, %v1246_v10  ;;  %v1168_v14 = vadd.f32 %v1167_v12, %v998_v11 }
 0x125   : > { %v1603_v15 = vadd.f32 %v2543_v0, %v1535_v13  ;;  %v1504_v16 = vmul.f32 %v2538_v59, %v1168_v14 }
 0x127   : > { %v1667_v17 = vmax.f32 %v1603_v15, 0.0  ;;  %v1572_v18 = vadd.f32 %v2543_v0, %v1504_v16  ;;  %v1078_v19 = vpop.f32.mrf.mxu2 }
 0x128   : > { %v1247_v20 = vpop.f32.mrf.mxu3 }
 0x129   : > { %1731 = vst [vmem:[%s2552_s14 + $0x170] sm:$0xff] %v1667_v17  ;;  %v1636_v21 = vmax.f32 %v1572_v18, 0.0  ;;  %v1248_v22 = vadd.f32 %v1247_v20, %v1078_v19  ;;  %v1001_v23 = vpop.f32.mrf.mxu0 }
 0x12a   : > { %v1170_v24 = vpop.f32.mrf.mxu1 }
 0x12b   : > { %1700 = vst [vmem:[%s2552_s14 + $0x78] sm:$0xff] %v1636_v21  ;;  %v1536_v25 = vmul.f32 %v2538_v59, %v1248_v22  ;;  %v1171_v26 = vadd.f32 %v1170_v24, %v1001_v23 }
 0x12d   : > { %v1604_v27 = vadd.f32 %v2543_v0, %v1536_v25  ;;  %v1505_v28 = vmul.f32 %v2538_v59, %v1171_v26 }
 0x12f   : > { %v1668_v29 = vmax.f32 %v1604_v27, 0.0  ;;  %v1573_v30 = vadd.f32 %v2543_v0, %v1505_v28  ;;  %v1081_v31 = vpop.f32.mrf.mxu2 }
 0x130   : > { %v1250_v32 = vpop.f32.mrf.mxu3 }
 0x131   : > { %1732 = vst [vmem:[%s2552_s14 + $0x178] sm:$0xff] %v1668_v29  ;;  %v1637_v33 = vmax.f32 %v1573_v30, 0.0  ;;  %v1251_v34 = vadd.f32 %v1250_v32, %v1081_v31  ;;  %v1003_v35 = vpop.f32.mrf.mxu0 }
 0x132   : > { %v1172_v36 = vpop.f32.mrf.mxu1 }
 0x133   : > { %1701 = vst [vmem:[%s2552_s14 + $0x80] sm:$0xff] %v1637_v33  ;;  %v1537_v37 = vmul.f32 %v2538_v59, %v1251_v34  ;;  %v1173_v38 = vadd.f32 %v1172_v36, %v1003_v35 }
 0x135   : > { %v1605_v39 = vadd.f32 %v2543_v0, %v1537_v37  ;;  %v1506_v40 = vmul.f32 %v2538_v59, %v1173_v38 }
 0x137   : > { %v1669_v41 = vmax.f32 %v1605_v39, 0.0  ;;  %v1574_v42 = vadd.f32 %v2543_v0, %v1506_v40  ;;  %v1083_v43 = vpop.f32.mrf.mxu2 }
 0x138   : > { %v1252_v44 = vpop.f32.mrf.mxu3 }
 0x139   : > { %1733 = vst [vmem:[%s2552_s14 + $0x180] sm:$0xff] %v1669_v41  ;;  %v1638_v45 = vmax.f32 %v1574_v42, 0.0  ;;  %v1253_v46 = vadd.f32 %v1252_v44, %v1083_v43  ;;  %v1006_v47 = vpop.f32.mrf.mxu0 }
 0x13a   : > { %v1175_v48 = vpop.f32.mrf.mxu1 }
 0x13b   : > { %1702 = vst [vmem:[%s2552_s14 + $0x88] sm:$0xff] %v1638_v45  ;;  %v1538_v49 = vmul.f32 %v2538_v59, %v1253_v46  ;;  %v1176_v50 = vadd.f32 %v1175_v48, %v1006_v47 }
 0x13d   : > { %v1606_v51 = vadd.f32 %v2543_v0, %v1538_v49  ;;  %v1507_v52 = vmul.f32 %v2538_v59, %v1176_v50 }
 0x13f   : > { %v1670_v53 = vmax.f32 %v1606_v51, 0.0  ;;  %v1575_v54 = vadd.f32 %v2543_v0, %v1507_v52  ;;  %v1086_v55 = vpop.f32.mrf.mxu2 }
 0x140   : > { %v1255_v56 = vpop.f32.mrf.mxu3 }
 0x141   : > { %1734 = vst [vmem:[%s2552_s14 + $0x188] sm:$0xff] %v1670_v53  ;;  %v1639_v57 = vmax.f32 %v1575_v54, 0.0  ;;  %v1256_v58 = vadd.f32 %v1255_v56, %v1086_v55  ;;  %v1008_v60 = vpop.f32.mrf.mxu0 }
 0x142   : > { %v1177_v61 = vpop.f32.mrf.mxu1 }
 0x143   : > { %1703 = vst [vmem:[%s2552_s14 + $0x90] sm:$0xff] %v1639_v57  ;;  %v1539_v62 = vmul.f32 %v2538_v59, %v1256_v58  ;;  %v1178_v63 = vadd.f32 %v1177_v61, %v1008_v60 }
 0x145   : > { %v1607_v1 = vadd.f32 %v2543_v0, %v1539_v62  ;;  %v1508_v2 = vmul.f32 %v2538_v59, %v1178_v63 }
 0x147   : > { %v1671_v3 = vmax.f32 %v1607_v1, 0.0  ;;  %v1576_v4 = vadd.f32 %v2543_v0, %v1508_v2  ;;  %v1088_v5 = vpop.f32.mrf.mxu2 }
 0x148   : > { %v1257_v6 = vpop.f32.mrf.mxu3 }
 0x149   : > { %1735 = vst [vmem:[%s2552_s14 + $0x190] sm:$0xff] %v1671_v3  ;;  %v1640_v7 = vmax.f32 %v1576_v4, 0.0  ;;  %v1258_v8 = vadd.f32 %v1257_v6, %v1088_v5  ;;  %v1011_v9 = vpop.f32.mrf.mxu0 }
 0x14a   : > { %v1180_v10 = vpop.f32.mrf.mxu1 }
 0x14b   : > { %1704 = vst [vmem:[%s2552_s14 + $0x98] sm:$0xff] %v1640_v7  ;;  %v1540_v11 = vmul.f32 %v2538_v59, %v1258_v8  ;;  %v1181_v12 = vadd.f32 %v1180_v10, %v1011_v9 }
 0x14d   : > { %v1608_v13 = vadd.f32 %v2543_v0, %v1540_v11  ;;  %v1509_v14 = vmul.f32 %v2538_v59, %v1181_v12 }
 0x14f   : > { %v1672_v15 = vmax.f32 %v1608_v13, 0.0  ;;  %v1577_v16 = vadd.f32 %v2543_v0, %v1509_v14  ;;  %v1091_v17 = vpop.f32.mrf.mxu2 }
 0x150   : > { %v1260_v18 = vpop.f32.mrf.mxu3 }
 0x151   : > { %1736 = vst [vmem:[%s2552_s14 + $0x198] sm:$0xff] %v1672_v15  ;;  %v1641_v19 = vmax.f32 %v1577_v16, 0.0  ;;  %v1261_v20 = vadd.f32 %v1260_v18, %v1091_v17  ;;  %v1013_v21 = vpop.f32.mrf.mxu0 }
 0x152   : > { %v1182_v22 = vpop.f32.mrf.mxu1 }
 0x153   : > { %1705 = vst [vmem:[%s2552_s14 + $0xa0] sm:$0xff] %v1641_v19  ;;  %v1541_v23 = vmul.f32 %v2538_v59, %v1261_v20  ;;  %v1183_v24 = vadd.f32 %v1182_v22, %v1013_v21 }
 0x155   : > { %v1609_v25 = vadd.f32 %v2543_v0, %v1541_v23  ;;  %v1510_v26 = vmul.f32 %v2538_v59, %v1183_v24 }
 0x157   : > { %v1673_v27 = vmax.f32 %v1609_v25, 0.0  ;;  %v1578_v28 = vadd.f32 %v2543_v0, %v1510_v26  ;;  %v1093_v29 = vpop.f32.mrf.mxu2 }
 0x158   : > { %v1262_v30 = vpop.f32.mrf.mxu3 }
 0x159   : > { %1737 = vst [vmem:[%s2552_s14 + $0x1a0] sm:$0xff] %v1673_v27  ;;  %v1642_v31 = vmax.f32 %v1578_v28, 0.0  ;;  %v1263_v32 = vadd.f32 %v1262_v30, %v1093_v29  ;;  %v1016_v33 = vpop.f32.mrf.mxu0 }
 0x15a   : > { %v1185_v34 = vpop.f32.mrf.mxu1 }
 0x15b   : > { %1706 = vst [vmem:[%s2552_s14 + $0xa8] sm:$0xff] %v1642_v31  ;;  %v1542_v35 = vmul.f32 %v2538_v59, %v1263_v32  ;;  %v1186_v36 = vadd.f32 %v1185_v34, %v1016_v33 }
 0x15d   : > { %v1610_v37 = vadd.f32 %v2543_v0, %v1542_v35  ;;  %v1511_v38 = vmul.f32 %v2538_v59, %v1186_v36 }
 0x15f   : > { %v1674_v39 = vmax.f32 %v1610_v37, 0.0  ;;  %v1579_v40 = vadd.f32 %v2543_v0, %v1511_v38  ;;  %v1096_v41 = vpop.f32.mrf.mxu2 }
 0x160   : > { %v1265_v42 = vpop.f32.mrf.mxu3 }
 0x161   : > { %1738 = vst [vmem:[%s2552_s14 + $0x1a8] sm:$0xff] %v1674_v39  ;;  %v1643_v43 = vmax.f32 %v1579_v40, 0.0  ;;  %v1266_v44 = vadd.f32 %v1265_v42, %v1096_v41  ;;  %v1018_v45 = vpop.f32.mrf.mxu0 }
 0x162   : > { %v1187_v46 = vpop.f32.mrf.mxu1 }
 0x163   : > { %1707 = vst [vmem:[%s2552_s14 + $0xb0] sm:$0xff] %v1643_v43  ;;  %v1543_v47 = vmul.f32 %v2538_v59, %v1266_v44  ;;  %v1188_v48 = vadd.f32 %v1187_v46, %v1018_v45 }
 0x165   : > { %v1611_v49 = vadd.f32 %v2543_v0, %v1543_v47  ;;  %v1512_v50 = vmul.f32 %v2538_v59, %v1188_v48  ;;  %v2333_v48 = vld [vmem:[%s2802_s2] ss:$0 sm:$0xff] }
 0x167   : > { %v1675_v51 = vmax.f32 %v1611_v49, 0.0  ;;  %v1580_v52 = vadd.f32 %v2543_v0, %v1512_v50  ;;  %v1098_v53 = vpop.f32.mrf.mxu2 }
 0x168   : > { %v1267_v54 = vpop.f32.mrf.mxu3 }
 0x169   : > { %1739 = vst [vmem:[%s2552_s14 + $0x1b0] sm:$0xff] %v1675_v51  ;;  %v1644_v55 = vmax.f32 %v1580_v52, 0.0  ;;  %v1268_v56 = vadd.f32 %v1267_v54, %v1098_v53  ;;  %v1021_v57 = vpop.f32.mrf.mxu0 }
 0x16a   : > { %v1190_v58 = vpop.f32.mrf.mxu1 }
 0x16b   : > { %1708 = vst [vmem:[%s2552_s14 + $0xb8] sm:$0xff] %v1644_v55  ;;  %v1544_v60 = vmul.f32 %v2538_v59, %v1268_v56  ;;  %v1191_v61 = vadd.f32 %v1190_v58, %v1021_v57 }
 0x16d   : > { %v1612_v62 = vadd.f32 %v2543_v0, %v1544_v60  ;;  %v1513_v63 = vmul.f32 %v2538_v59, %v1191_v61  ;;  %v2334_v60 = vld [vmem:[%s2803_s3] ss:$0 sm:$0xff] }
 0x16f   : > { %v1676_v1 = vmax.f32 %v1612_v62, 0.0  ;;  %v1581_v2 = vadd.f32 %v2543_v0, %v1513_v63  ;;  %v1101_v3 = vpop.f32.mrf.mxu2 }
 0x170   : > { %v1270_v4 = vpop.f32.mrf.mxu3 }
 0x171   : > { %1740 = vst [vmem:[%s2552_s14 + $0x1b8] sm:$0xff] %v1676_v1  ;;  %v1645_v5 = vmax.f32 %v1581_v2, 0.0  ;;  %v1271_v6 = vadd.f32 %v1270_v4, %v1101_v3  ;;  %v1023_v7 = vpop.f32.mrf.mxu0 }
 0x172   : > { %v1192_v8 = vpop.f32.mrf.mxu1 }
 0x173   : > { %1709 = vst [vmem:[%s2552_s14 + $0xc0] sm:$0xff] %v1645_v5  ;;  %v1545_v9 = vmul.f32 %v2538_v59, %v1271_v6  ;;  %v1193_v10 = vadd.f32 %v1192_v8, %v1023_v7 }
 0x175   : > { %v1613_v11 = vadd.f32 %v2543_v0, %v1545_v9  ;;  %v1514_v12 = vmul.f32 %v2538_v59, %v1193_v10 }
 0x177   : > { %v1677_v13 = vmax.f32 %v1613_v11, 0.0  ;;  %v1582_v14 = vadd.f32 %v2543_v0, %v1514_v12  ;;  %v1103_v15 = vpop.f32.mrf.mxu2 }
 0x178   : > { %v1272_v16 = vpop.f32.mrf.mxu3 }
 0x179   : > { %1741 = vst [vmem:[%s2552_s14 + $0x1c0] sm:$0xff] %v1677_v13  ;;  %v1646_v17 = vmax.f32 %v1582_v14, 0.0  ;;  %v1273_v18 = vadd.f32 %v1272_v16, %v1103_v15  ;;  %v1026_v19 = vpop.f32.mrf.mxu0 }
 0x17a   : > { %v1195_v20 = vpop.f32.mrf.mxu1 }
 0x17b   : > { %1710 = vst [vmem:[%s2552_s14 + $0xc8] sm:$0xff] %v1646_v17  ;;  %v1546_v21 = vmul.f32 %v2538_v59, %v1273_v18  ;;  %v1196_v22 = vadd.f32 %v1195_v20, %v1026_v19 }
 0x17d   : > { %v1614_v23 = vadd.f32 %v2543_v0, %v1546_v21  ;;  %v1515_v24 = vmul.f32 %v2538_v59, %v1196_v22 }
 0x17f   : > { %v1678_v25 = vmax.f32 %v1614_v23, 0.0  ;;  %v1583_v26 = vadd.f32 %v2543_v0, %v1515_v24  ;;  %v1106_v27 = vpop.f32.mrf.mxu2 }
 0x180   : > { %v1275_v28 = vpop.f32.mrf.mxu3 }
 0x181   : > { %1742 = vst [vmem:[%s2552_s14 + $0x1c8] sm:$0xff] %v1678_v25  ;;  %v1647_v29 = vmax.f32 %v1583_v26, 0.0  ;;  %v1276_v30 = vadd.f32 %v1275_v28, %v1106_v27  ;;  %v1028_v31 = vpop.f32.mrf.mxu0 }
 0x182   : > { %v1197_v32 = vpop.f32.mrf.mxu1 }
 0x183   : > { %1711 = vst [vmem:[%s2552_s14 + $0xd0] sm:$0xff] %v1647_v29  ;;  %v1547_v33 = vmul.f32 %v2538_v59, %v1276_v30  ;;  %v1198_v34 = vadd.f32 %v1197_v32, %v1028_v31 }
 0x185   : > { %v1615_v35 = vadd.f32 %v2543_v0, %v1547_v33  ;;  %v1516_v36 = vmul.f32 %v2538_v59, %v1198_v34 }
 0x187   : > { %v1679_v37 = vmax.f32 %v1615_v35, 0.0  ;;  %v1584_v38 = vadd.f32 %v2543_v0, %v1516_v36  ;;  %v1108_v39 = vpop.f32.mrf.mxu2 }
 0x188   : > { %v1277_v40 = vpop.f32.mrf.mxu3 }
 0x189   : > { %1743 = vst [vmem:[%s2552_s14 + $0x1d0] sm:$0xff] %v1679_v37  ;;  %v1648_v41 = vmax.f32 %v1584_v38, 0.0  ;;  %v1278_v42 = vadd.f32 %v1277_v40, %v1108_v39  ;;  %v1031_v43 = vpop.f32.mrf.mxu0 }
 0x18a   : > { %v1200_v44 = vpop.f32.mrf.mxu1 }
 0x18b   : > { %1712 = vst [vmem:[%s2552_s14 + $0xd8] sm:$0xff] %v1648_v41  ;;  %v1548_v45 = vmul.f32 %v2538_v59, %v1278_v42  ;;  %v1201_v46 = vadd.f32 %v1200_v44, %v1031_v43 }
 0x18d   : > { %v1616_v47 = vadd.f32 %v2543_v0, %v1548_v45  ;;  %v1517_v49 = vmul.f32 %v2333_v48, %v1201_v46 }
 0x18f   : > { %v1680_v50 = vmax.f32 %v1616_v47, 0.0  ;;  %v1585_v51 = vadd.f32 %v2543_v0, %v1517_v49  ;;  %v1111_v52 = vpop.f32.mrf.mxu2 }
 0x190   : > { %v1280_v53 = vpop.f32.mrf.mxu3 }
 0x191   : > { %1744 = vst [vmem:[%s2552_s14 + $0x1d8] sm:$0xff] %v1680_v50  ;;  %v1649_v54 = vmax.f32 %v1585_v51, 0.0  ;;  %v1281_v55 = vadd.f32 %v1280_v53, %v1111_v52  ;;  %v1033_v56 = vpop.f32.mrf.mxu0 }
 0x192   : > { %v1202_v57 = vpop.f32.mrf.mxu1 }
 0x193   : > { %1713 = vst [vmem:[%s2552_s14 + $0xe0] sm:$0xff] %v1649_v54  ;;  %v1549_v59 = vmul.f32 %v2333_v48, %v1281_v55  ;;  %v1203_v58 = vadd.f32 %v1202_v57, %v1033_v56 }
 0x195   : > { %v1617_v61 = vadd.f32 %v2334_v60, %v1549_v59  ;;  %v1518_v62 = vmul.f32 %v2333_v48, %v1203_v58 }
 0x197   : > { %v1681_v63 = vmax.f32 %v1617_v61, 0.0  ;;  %v1586_v0 = vadd.f32 %v2334_v60, %v1518_v62  ;;  %v1113_v1 = vpop.f32.mrf.mxu2 }
 0x198   : > { %v1282_v2 = vpop.f32.mrf.mxu3 }
 0x199   : > { %1745 = vst [vmem:[%s2552_s14 + $0x1e0] sm:$0xff] %v1681_v63  ;;  %v1650_v3 = vmax.f32 %v1586_v0, 0.0  ;;  %v1283_v4 = vadd.f32 %v1282_v2, %v1113_v1  ;;  %v1036_v5 = vpop.f32.mrf.mxu0 }
 0x19a   : > { %v1205_v6 = vpop.f32.mrf.mxu1 }
 0x19b   : > { %1714 = vst [vmem:[%s2552_s14 + $0xe8] sm:$0xff] %v1650_v3  ;;  %v1550_v7 = vmul.f32 %v2333_v48, %v1283_v4  ;;  %v1206_v8 = vadd.f32 %v1205_v6, %v1036_v5 }
 0x19d   : > { %v1618_v9 = vadd.f32 %v2334_v60, %v1550_v7  ;;  %v1519_v10 = vmul.f32 %v2333_v48, %v1206_v8 }
 0x19f   : > { %v1682_v11 = vmax.f32 %v1618_v9, 0.0  ;;  %v1587_v12 = vadd.f32 %v2334_v60, %v1519_v10  ;;  %v1116_v13 = vpop.f32.mrf.mxu2 }
 0x1a0   : > { %v1285_v14 = vpop.f32.mrf.mxu3 }
 0x1a1   : > { %1746 = vst [vmem:[%s2552_s14 + $0x1e8] sm:$0xff] %v1682_v11  ;;  %v1651_v15 = vmax.f32 %v1587_v12, 0.0  ;;  %v1286_v16 = vadd.f32 %v1285_v14, %v1116_v13  ;;  %v1038_v17 = vpop.f32.mrf.mxu0 }
 0x1a2   : > { %v1207_v18 = vpop.f32.mrf.mxu1 }
 0x1a3   : > { %1715 = vst [vmem:[%s2552_s14 + $0xf0] sm:$0xff] %v1651_v15  ;;  %v1551_v19 = vmul.f32 %v2333_v48, %v1286_v16  ;;  %v1208_v20 = vadd.f32 %v1207_v18, %v1038_v17 }
 0x1a5   : > { %v1619_v21 = vadd.f32 %v2334_v60, %v1551_v19  ;;  %v1520_v22 = vmul.f32 %v2333_v48, %v1208_v20 }
 0x1a7   : > { %v1683_v23 = vmax.f32 %v1619_v21, 0.0  ;;  %v1588_v24 = vadd.f32 %v2334_v60, %v1520_v22  ;;  %v1118_v25 = vpop.f32.mrf.mxu2 }
 0x1a8   : > { %v1287_v26 = vpop.f32.mrf.mxu3 }
 0x1a9   : > { %1747 = vst [vmem:[%s2552_s14 + $0x1f0] sm:$0xff] %v1683_v23  ;;  %v1652_v27 = vmax.f32 %v1588_v24, 0.0  ;;  %v1288_v28 = vadd.f32 %v1287_v26, %v1118_v25 }
 0x1ab   : > { %1716 = vst [vmem:[%s2552_s14 + $0xf8] sm:$0xff] %v1652_v27  ;;  %v1552_v29 = vmul.f32 %v2333_v48, %v1288_v28 }
 0x1ad   : > { %v1620_v30 = vadd.f32 %v2334_v60, %v1552_v29 }
 0x1af   : > { %v1684_v31 = vmax.f32 %v1620_v30, 0.0 }
 0x1b1   : > { %1748 = vst [vmem:[%s2552_s14 + $0x1f8] sm:$0xff] %v1684_v31 }
 0x1b2 PF: > { %s14_s17 = sadd.s32 1, %s2357_s17   ;;  %s2805_s15 = smov %s2353_s16 }
 0x1b3   : > { %p11_p5 = scmp.ge.s32.totalorder %s14_s17, 6   ;;  %s2806_s16 = smov %s2808_s18 }
 0x1b5   :  { %13 = sbr.rel (!%p11_p5) target bundleno = 2 (0x2), region = 83 }

</bundles_post_ra>
